<compile_context>
chip_gen: v6e
topology: v6e:2x2x1
jax: 0.10.0
libtpu: 0.0.40
codegen_flags: <defaults>
</compile_context>

<pallas_src>
import functools

import jax
import jax.numpy as jnp
import numpy as np
from jax.experimental import pallas as pl
from jax.experimental.pallas import tpu as pltpu

F5 = 5  # A_region_compute is hard-coded to 5 input features in the PyTorch module


def _round_up(v, m):
    return (v + m - 1) // m * m


def _pick_batch_block(bs):
    # Amortize the ~0.35us/grid-step overhead, but keep >=2 grid steps when
    # possible so the "parallel" batch axis can shard across both v7x cores.
    if bs <= 2:
        return 1
    best = 1
    for d in range(1, min(8, bs // 2) + 1):
        if bs % d == 0:
            best = d
    return best


def krm_kernel(feat_ref, featT_ref, x_ref, w1t_all_ref, w1s_ref, b1_ref,
               w2_ref, wl_ref, bl_ref, out_ref, *, num_A):
    # feat_ref : (B, N, F5) f32       featT_ref: (B, F5, N) f32
    # x_ref    : (B, N, Fin) bf16
    # w1t_all  : (F5, num_A*F5) f32   w1s_ref  : (num_A*F5, F5) f32
    # b1_ref   : (num_A*F5, 1) f32    w2_ref   : (num_A, F5) f32 (SMEM)
    # wl_ref   : (Fin, Fout_pad) bf16 bl_ref   : (1, Fout_pad) f32
    # out_ref  : (B, N, Fout_pad) f32
    B, N, _ = feat_ref.shape

    for b in range(B):  # B is a small batch block; fully unrolled
        f = feat_ref[b]                 # (N, F5)
        fT = featT_ref[b]               # (F5, N)

        # All heads' 1x1 conv #1 fused into one MXU push per orientation:
        #   G_all[m, i*F5+c]  = (W1_i f[m])_c
        #   GT_all[i*F5+c, n] = (W1_i f[n])_c + b1_i[c]   (b1 folded once here)
        G_all = jnp.dot(f, w1t_all_ref[...], preferred_element_type=jnp.float32)
        GT_all = (jnp.dot(w1s_ref[...], fT, preferred_element_type=jnp.float32)
                  + b1_ref[...])

        A = jnp.zeros((N, N), jnp.float32)
        for i in range(num_A):
            S = jnp.zeros((N, N), jnp.float32)
            for c in range(F5):
                idx = i * F5 + c
                gcol = G_all[:, idx:idx + 1]    # (N, 1): G_i[m, c]
                grow = GT_all[idx:idx + 1, :]   # (1, N): G_i[n, c] + b1_i[c]
                # relu + 1x1 conv #2 contraction (w2 scalar from SMEM)
                S = S + w2_ref[i, c] * jnp.maximum(grow - gcol, 0.0)
            # softmax over last axis (PyTorch F.softmax(..., dim=2)); b2 dropped
            # because softmax is shift-invariant.
            S = S - jnp.max(S, axis=-1, keepdims=True)
            E = jnp.exp(S)
            A = A + E * pl.reciprocal(jnp.sum(E, axis=-1, keepdims=True),
                                      approx=True)

        # A <- A + num_A * I, then normalize by column sums
        # (PyTorch: A / A.sum(1).unsqueeze(1)).
        d = jnp.sum(A, axis=0, keepdims=True) + jnp.float32(num_A)   # (1, N)
        inv_d = pl.reciprocal(d, approx=True)
        ids_r = jax.lax.broadcasted_iota(jnp.int32, (N, 1), 0)
        ids_c = jax.lax.broadcasted_iota(jnp.int32, (1, N), 1)
        A = jnp.where(ids_r == ids_c, A + jnp.float32(num_A), A)
        A = (A * inv_d).astype(jnp.bfloat16)

        # bmm + region_squeeze (nn.Linear): bf16 MXU with f32 accumulation.
        y = jnp.dot(A, x_ref[b], preferred_element_type=jnp.float32)  # (N, Fin)
        out = (jnp.dot(y.astype(jnp.bfloat16), wl_ref[...],
                       preferred_element_type=jnp.float32)
               + bl_ref[...])                                         # (N, Fout_pad)
        out_ref[b] = out


def know_rout_mod_im(feat, x, w1, b1, w2, b2, wl, bl):
    """feat: (bs, N, 5), x: (bs, N, Fin),
    w1: (num_A, 5, 5) conv2d_1 weight (out,in), b1: (num_A, 5),
    w2: (num_A, 5) conv2d_2 weight, b2: (num_A,) (mathematically a no-op),
    wl: (Fin, Fout) Linear weight already (in, out), bl: (Fout,)."""
    del b2  # softmax is invariant to the additive b2 bias
    bs, N, f5 = feat.shape
    assert f5 == F5
    Fin = x.shape[2]
    Fout = wl.shape[1]
    num_A = w1.shape[0]

    Fout_pad = _round_up(Fout, 128)      # lane-dense output writeback
    B_BLK = _pick_batch_block(bs)

    feat = feat.astype(jnp.float32)
    featT = jnp.transpose(feat, (0, 2, 1))                      # (bs, F5, N)
    x_bf = x.astype(jnp.bfloat16)
    w1s = w1.reshape(num_A * F5, F5).astype(jnp.float32)        # stacked heads
    w1t_all = w1s.T                                             # (F5, num_A*F5)
    b1_col = b1.reshape(num_A * F5, 1).astype(jnp.float32)
    w2 = w2.astype(jnp.float32)
    wl_p = jnp.pad(wl.astype(jnp.float32),
                   ((0, 0), (0, Fout_pad - Fout))).astype(jnp.bfloat16)
    bl_p = jnp.pad(bl.astype(jnp.float32),
                   (0, Fout_pad - Fout)).reshape(1, Fout_pad)

    kernel = functools.partial(krm_kernel, num_A=num_A)
    out = pl.pallas_call(
        kernel,
        out_shape=jax.ShapeDtypeStruct((bs, N, Fout_pad), jnp.float32),
        grid=(bs // B_BLK,),
        in_specs=[
            pl.BlockSpec((B_BLK, N, F5), lambda g: (g, 0, 0)),
            pl.BlockSpec((B_BLK, F5, N), lambda g: (g, 0, 0)),
            pl.BlockSpec((B_BLK, N, Fin), lambda g: (g, 0, 0)),
            pl.BlockSpec((F5, num_A * F5), lambda g: (0, 0)),
            pl.BlockSpec((num_A * F5, F5), lambda g: (0, 0)),
            pl.BlockSpec((num_A * F5, 1), lambda g: (0, 0)),
            pl.BlockSpec(memory_space=pltpu.MemorySpace.SMEM),
            pl.BlockSpec((Fin, Fout_pad), lambda g: (0, 0)),
            pl.BlockSpec((1, Fout_pad), lambda g: (0, 0)),
        ],
        out_specs=pl.BlockSpec((B_BLK, N, Fout_pad), lambda g: (g, 0, 0)),
        compiler_params=pltpu.CompilerParams(
            dimension_semantics=("parallel",),          # batch steps independent
            vmem_limit_bytes=32 * 1024 * 1024,          # headroom for large N
        ),
    )(feat, featT, x_bf, w1t_all, w1s, b1_col, w2, wl_p, bl_p)
    return out[..., :Fout] if Fout_pad != Fout else out


def reference(feat, x, w1, b1, w2, b2, wl, bl):
    """Pure-JAX f32 replica of the PyTorch forward, for verification."""
    bs, N, f5 = feat.shape
    num_A = w1.shape[0]
    A = jnp.tile(jnp.eye(N, dtype=jnp.float32)[None] * num_A, (bs, 1, 1))
    for i in range(num_A):
        G = jnp.einsum('bnf,cf->bnc', feat, w1[i])
        pre = G[:, None, :, :] - G[:, :, None, :] + b1[i][None, None, None, :]
        S = jnp.einsum('bmnc,c->bmn', jax.nn.relu(pre), w2[i]) + b2[i]
        A = A + jax.nn.softmax(S, axis=2)
    A = A / jnp.sum(A, axis=1, keepdims=True)
    y = jnp.einsum('bmn,bnk->bmk', A, x)
    return jnp.einsum('bmk,ko->bmo', y, wl) + bl


if __name__ == "__main__":
    bs, N, Fin, Fout, num_A = 2, 8, 32, 16, 3

    key = jax.random.PRNGKey(0)
    ks = jax.random.split(key, 8)
    feat = jax.random.normal(ks[0], (bs, N, F5), jnp.float32)
    x = jax.random.normal(ks[1], (bs, N, Fin), jnp.float32)
    # deterministic synthetic parameters (conv2d_1, conv2d_2 per head; Linear)
    w1 = jax.random.normal(ks[2], (num_A, F5, F5), jnp.float32) * 0.5
    b1 = jax.random.normal(ks[3], (num_A, F5), jnp.float32) * 0.1
    w2 = jax.random.normal(ks[4], (num_A, F5), jnp.float32) * 0.5
    b2 = jax.random.normal(ks[5], (num_A,), jnp.float32) * 0.1
    wl = jax.random.normal(ks[6], (Fin, Fout), jnp.float32) * (1.0 / np.sqrt(Fin))
    bl = jax.random.normal(ks[7], (Fout,), jnp.float32) * 0.1

    out = know_rout_mod_im(feat, x, w1, b1, w2, b2, wl, bl)
    jax.block_until_ready(out)

    ref = reference(feat, x, w1, b1, w2, b2, wl, bl)
    assert out.shape == (bs, N, Fout)
    # tolerance loosened vs. pure-f32: bf16 MXU matmuls + approx reciprocals
    np.testing.assert_allclose(np.asarray(out), np.asarray(ref),
                               rtol=2e-2, atol=2e-2)
    print("KERNEL_OK")
</pallas_src>

<mosaic_0001>
module attributes {stable_mosaic.version = 11 : i64} {
  func.func @krm_kernel(%arg0: i32, %arg1: memref<1x8x5xf32, #tpu.memory_space<vmem>>, %arg2: memref<1x5x8xf32, #tpu.memory_space<vmem>>, %arg3: memref<1x8x32xbf16, #tpu.memory_space<vmem>>, %arg4: memref<5x15xf32, #tpu.memory_space<vmem>>, %arg5: memref<15x5xf32, #tpu.memory_space<vmem>>, %arg6: memref<15x1xf32, #tpu.memory_space<vmem>>, %arg7: memref<3x5xf32, #tpu.memory_space<smem>>, %arg8: memref<32x128xbf16, #tpu.memory_space<vmem>>, %arg9: memref<1x128xf32, #tpu.memory_space<vmem>>, %arg10: memref<1x8x128xf32, #tpu.memory_space<vmem>>) attributes {dimension_semantics = [#tpu.dimension_semantics<parallel>], iteration_bounds = array<i64: 2>, scalar_prefetch = 0 : i64, scratch_operands = 0 : i64, tpu.core_type = #tpu.core_type<tc>, window_params = [{transform_indices = @transform_0, window_bounds = array<i64: 1, 8, 5>}, {transform_indices = @transform_1, window_bounds = array<i64: 1, 5, 8>}, {transform_indices = @transform_2, window_bounds = array<i64: 1, 8, 32>}, {pipeline_mode = #tpu.pipeline_mode<synchronous>, transform_indices = @transform_3, window_bounds = array<i64: 5, 15>}, {pipeline_mode = #tpu.pipeline_mode<synchronous>, transform_indices = @transform_4, window_bounds = array<i64: 15, 5>}, {pipeline_mode = #tpu.pipeline_mode<synchronous>, transform_indices = @transform_5, window_bounds = array<i64: 15, 1>}, {transform_indices = @transform_6, window_bounds = array<i64: 3, 5>}, {pipeline_mode = #tpu.pipeline_mode<synchronous>, transform_indices = @transform_7, window_bounds = array<i64: 32, 128>}, {pipeline_mode = #tpu.pipeline_mode<synchronous>, transform_indices = @transform_8, window_bounds = array<i64: 1, 128>}, {transform_indices = @transform_9, window_bounds = array<i64: 1, 8, 128>}]} {
    %c0 = arith.constant 0 : index
    %c0_0 = arith.constant 0 : index
    %c0_1 = arith.constant 0 : index
    %0 = vector.load %arg1[%c0, %c0_0, %c0_1] : memref<1x8x5xf32, #tpu.memory_space<vmem>>, vector<1x8x5xf32>
    %1 = vector.shape_cast %0 : vector<1x8x5xf32> to vector<8x5xf32>
    %c0_2 = arith.constant 0 : index
    %c0_3 = arith.constant 0 : index
    %c0_4 = arith.constant 0 : index
    %2 = vector.load %arg2[%c0_2, %c0_3, %c0_4] : memref<1x5x8xf32, #tpu.memory_space<vmem>>, vector<1x5x8xf32>
    %3 = vector.shape_cast %2 : vector<1x5x8xf32> to vector<5x8xf32>
    %c0_5 = arith.constant 0 : index
    %c0_6 = arith.constant 0 : index
    %4 = vector.load %arg4[%c0_5, %c0_6] : memref<5x15xf32, #tpu.memory_space<vmem>>, vector<5x15xf32>
    %cst = arith.constant dense<0.000000e+00> : vector<8x15xf32>
    %5 = tpu.matmul %1, %4, %cst {dimension_numbers = #tpu.dot_dimension_numbers<[1], [0], [0], [1], [0, 0, 1, 1], [], []>} : vector<8x5xf32>, vector<5x15xf32>, vector<8x15xf32> -> vector<8x15xf32>
    %c0_7 = arith.constant 0 : index
    %c0_8 = arith.constant 0 : index
    %6 = vector.load %arg5[%c0_7, %c0_8] : memref<15x5xf32, #tpu.memory_space<vmem>>, vector<15x5xf32>
    %cst_9 = arith.constant dense<0.000000e+00> : vector<15x8xf32>
    %7 = tpu.matmul %6, %3, %cst_9 {dimension_numbers = #tpu.dot_dimension_numbers<[1], [0], [0], [1], [0, 0, 1, 1], [], []>} : vector<15x5xf32>, vector<5x8xf32>, vector<15x8xf32> -> vector<15x8xf32>
    %c0_10 = arith.constant 0 : index
    %c0_11 = arith.constant 0 : index
    %8 = vector.load %arg6[%c0_10, %c0_11] : memref<15x1xf32, #tpu.memory_space<vmem>>, vector<15x1xf32>
    %9 = vector.broadcast %8 : vector<15x1xf32> to vector<15x8xf32>
    %10 = arith.addf %7, %9 : vector<15x8xf32>
    %cst_12 = arith.constant 0.000000e+00 : f32
    %11 = vector.broadcast %cst_12 : f32 to vector<8x8xf32>
    %cst_13 = arith.constant 0.000000e+00 : f32
    %12 = vector.broadcast %cst_13 : f32 to vector<8x8xf32>
    %13 = vector.extract_strided_slice %5 {offsets = [0, 0], sizes = [8, 1], strides = [1, 1]} : vector<8x15xf32> to vector<8x1xf32>
    %14 = vector.extract_strided_slice %10 {offsets = [0, 0], sizes = [1, 8], strides = [1, 1]} : vector<15x8xf32> to vector<1x8xf32>
    %c0_14 = arith.constant 0 : index
    %c0_15 = arith.constant 0 : index
    %15 = memref.load %arg7[%c0_14, %c0_15] : memref<3x5xf32, #tpu.memory_space<smem>>
    %16 = vector.broadcast %14 : vector<1x8xf32> to vector<8x8xf32>
    %17 = vector.broadcast %13 : vector<8x1xf32> to vector<8x8xf32>
    %18 = arith.subf %16, %17 : vector<8x8xf32>
    %cst_16 = arith.constant 0.000000e+00 : f32
    %19 = vector.broadcast %cst_16 : f32 to vector<8x8xf32>
    %20 = arith.maximumf %18, %19 : vector<8x8xf32>
    %21 = vector.broadcast %15 : f32 to vector<8x8xf32>
    %22 = arith.mulf %21, %20 : vector<8x8xf32>
    %23 = arith.addf %12, %22 : vector<8x8xf32>
    %24 = vector.extract_strided_slice %5 {offsets = [0, 1], sizes = [8, 1], strides = [1, 1]} : vector<8x15xf32> to vector<8x1xf32>
    %25 = vector.extract_strided_slice %10 {offsets = [1, 0], sizes = [1, 8], strides = [1, 1]} : vector<15x8xf32> to vector<1x8xf32>
    %c0_17 = arith.constant 0 : index
    %c1 = arith.constant 1 : index
    %26 = memref.load %arg7[%c0_17, %c1] : memref<3x5xf32, #tpu.memory_space<smem>>
    %27 = vector.broadcast %25 : vector<1x8xf32> to vector<8x8xf32>
    %28 = vector.broadcast %24 : vector<8x1xf32> to vector<8x8xf32>
    %29 = arith.subf %27, %28 : vector<8x8xf32>
    %cst_18 = arith.constant 0.000000e+00 : f32
    %30 = vector.broadcast %cst_18 : f32 to vector<8x8xf32>
    %31 = arith.maximumf %29, %30 : vector<8x8xf32>
    %32 = vector.broadcast %26 : f32 to vector<8x8xf32>
    %33 = arith.mulf %32, %31 : vector<8x8xf32>
    %34 = arith.addf %23, %33 : vector<8x8xf32>
    %35 = vector.extract_strided_slice %5 {offsets = [0, 2], sizes = [8, 1], strides = [1, 1]} : vector<8x15xf32> to vector<8x1xf32>
    %36 = vector.extract_strided_slice %10 {offsets = [2, 0], sizes = [1, 8], strides = [1, 1]} : vector<15x8xf32> to vector<1x8xf32>
    %c0_19 = arith.constant 0 : index
    %c2 = arith.constant 2 : index
    %37 = memref.load %arg7[%c0_19, %c2] : memref<3x5xf32, #tpu.memory_space<smem>>
    %38 = vector.broadcast %36 : vector<1x8xf32> to vector<8x8xf32>
    %39 = vector.broadcast %35 : vector<8x1xf32> to vector<8x8xf32>
    %40 = arith.subf %38, %39 : vector<8x8xf32>
    %cst_20 = arith.constant 0.000000e+00 : f32
    %41 = vector.broadcast %cst_20 : f32 to vector<8x8xf32>
    %42 = arith.maximumf %40, %41 : vector<8x8xf32>
    %43 = vector.broadcast %37 : f32 to vector<8x8xf32>
    %44 = arith.mulf %43, %42 : vector<8x8xf32>
    %45 = arith.addf %34, %44 : vector<8x8xf32>
    %46 = vector.extract_strided_slice %5 {offsets = [0, 3], sizes = [8, 1], strides = [1, 1]} : vector<8x15xf32> to vector<8x1xf32>
    %47 = vector.extract_strided_slice %10 {offsets = [3, 0], sizes = [1, 8], strides = [1, 1]} : vector<15x8xf32> to vector<1x8xf32>
    %c0_21 = arith.constant 0 : index
    %c3 = arith.constant 3 : index
    %48 = memref.load %arg7[%c0_21, %c3] : memref<3x5xf32, #tpu.memory_space<smem>>
    %49 = vector.broadcast %47 : vector<1x8xf32> to vector<8x8xf32>
    %50 = vector.broadcast %46 : vector<8x1xf32> to vector<8x8xf32>
    %51 = arith.subf %49, %50 : vector<8x8xf32>
    %cst_22 = arith.constant 0.000000e+00 : f32
    %52 = vector.broadcast %cst_22 : f32 to vector<8x8xf32>
    %53 = arith.maximumf %51, %52 : vector<8x8xf32>
    %54 = vector.broadcast %48 : f32 to vector<8x8xf32>
    %55 = arith.mulf %54, %53 : vector<8x8xf32>
    %56 = arith.addf %45, %55 : vector<8x8xf32>
    %57 = vector.extract_strided_slice %5 {offsets = [0, 4], sizes = [8, 1], strides = [1, 1]} : vector<8x15xf32> to vector<8x1xf32>
    %58 = vector.extract_strided_slice %10 {offsets = [4, 0], sizes = [1, 8], strides = [1, 1]} : vector<15x8xf32> to vector<1x8xf32>
    %c0_23 = arith.constant 0 : index
    %c4 = arith.constant 4 : index
    %59 = memref.load %arg7[%c0_23, %c4] : memref<3x5xf32, #tpu.memory_space<smem>>
    %60 = vector.broadcast %58 : vector<1x8xf32> to vector<8x8xf32>
    %61 = vector.broadcast %57 : vector<8x1xf32> to vector<8x8xf32>
    %62 = arith.subf %60, %61 : vector<8x8xf32>
    %cst_24 = arith.constant 0.000000e+00 : f32
    %63 = vector.broadcast %cst_24 : f32 to vector<8x8xf32>
    %64 = arith.maximumf %62, %63 : vector<8x8xf32>
    %65 = vector.broadcast %59 : f32 to vector<8x8xf32>
    %66 = arith.mulf %65, %64 : vector<8x8xf32>
    %67 = arith.addf %56, %66 : vector<8x8xf32>
    %cst_25 = arith.constant dense<0xFF800000> : vector<8xf32>
    %68 = vector.multi_reduction <maximumf>, %67, %cst_25 [1] : vector<8x8xf32> to vector<8xf32>
    %69 = vector.shape_cast %68 : vector<8xf32> to vector<8x1xf32>
    %70 = vector.broadcast %69 : vector<8x1xf32> to vector<8x8xf32>
    %71 = arith.subf %67, %70 : vector<8x8xf32>
    %72 = math.exp %71 : vector<8x8xf32>
    %cst_26 = arith.constant dense<0.000000e+00> : vector<8xf32>
    %73 = vector.multi_reduction <add>, %72, %cst_26 [1] : vector<8x8xf32> to vector<8xf32>
    %74 = vector.shape_cast %73 : vector<8xf32> to vector<8x1xf32>
    %75 = tpu.reciprocal %74 {approx = true} : vector<8x1xf32> -> vector<8x1xf32>
    %76 = vector.broadcast %75 : vector<8x1xf32> to vector<8x8xf32>
    %77 = arith.mulf %72, %76 : vector<8x8xf32>
    %78 = arith.addf %11, %77 : vector<8x8xf32>
    %cst_27 = arith.constant 0.000000e+00 : f32
    %79 = vector.broadcast %cst_27 : f32 to vector<8x8xf32>
    %80 = vector.extract_strided_slice %5 {offsets = [0, 5], sizes = [8, 1], strides = [1, 1]} : vector<8x15xf32> to vector<8x1xf32>
    %81 = vector.extract_strided_slice %10 {offsets = [5, 0], sizes = [1, 8], strides = [1, 1]} : vector<15x8xf32> to vector<1x8xf32>
    %c1_28 = arith.constant 1 : index
    %c0_29 = arith.constant 0 : index
    %82 = memref.load %arg7[%c1_28, %c0_29] : memref<3x5xf32, #tpu.memory_space<smem>>
    %83 = vector.broadcast %81 : vector<1x8xf32> to vector<8x8xf32>
    %84 = vector.broadcast %80 : vector<8x1xf32> to vector<8x8xf32>
    %85 = arith.subf %83, %84 : vector<8x8xf32>
    %cst_30 = arith.constant 0.000000e+00 : f32
    %86 = vector.broadcast %cst_30 : f32 to vector<8x8xf32>
    %87 = arith.maximumf %85, %86 : vector<8x8xf32>
    %88 = vector.broadcast %82 : f32 to vector<8x8xf32>
    %89 = arith.mulf %88, %87 : vector<8x8xf32>
    %90 = arith.addf %79, %89 : vector<8x8xf32>
    %91 = vector.extract_strided_slice %5 {offsets = [0, 6], sizes = [8, 1], strides = [1, 1]} : vector<8x15xf32> to vector<8x1xf32>
    %92 = vector.extract_strided_slice %10 {offsets = [6, 0], sizes = [1, 8], strides = [1, 1]} : vector<15x8xf32> to vector<1x8xf32>
    %c1_31 = arith.constant 1 : index
    %c1_32 = arith.constant 1 : index
    %93 = memref.load %arg7[%c1_31, %c1_32] : memref<3x5xf32, #tpu.memory_space<smem>>
    %94 = vector.broadcast %92 : vector<1x8xf32> to vector<8x8xf32>
    %95 = vector.broadcast %91 : vector<8x1xf32> to vector<8x8xf32>
    %96 = arith.subf %94, %95 : vector<8x8xf32>
    %cst_33 = arith.constant 0.000000e+00 : f32
    %97 = vector.broadcast %cst_33 : f32 to vector<8x8xf32>
    %98 = arith.maximumf %96, %97 : vector<8x8xf32>
    %99 = vector.broadcast %93 : f32 to vector<8x8xf32>
    %100 = arith.mulf %99, %98 : vector<8x8xf32>
    %101 = arith.addf %90, %100 : vector<8x8xf32>
    %102 = vector.extract_strided_slice %5 {offsets = [0, 7], sizes = [8, 1], strides = [1, 1]} : vector<8x15xf32> to vector<8x1xf32>
    %103 = vector.extract_strided_slice %10 {offsets = [7, 0], sizes = [1, 8], strides = [1, 1]} : vector<15x8xf32> to vector<1x8xf32>
    %c1_34 = arith.constant 1 : index
    %c2_35 = arith.constant 2 : index
    %104 = memref.load %arg7[%c1_34, %c2_35] : memref<3x5xf32, #tpu.memory_space<smem>>
    %105 = vector.broadcast %103 : vector<1x8xf32> to vector<8x8xf32>
    %106 = vector.broadcast %102 : vector<8x1xf32> to vector<8x8xf32>
    %107 = arith.subf %105, %106 : vector<8x8xf32>
    %cst_36 = arith.constant 0.000000e+00 : f32
    %108 = vector.broadcast %cst_36 : f32 to vector<8x8xf32>
    %109 = arith.maximumf %107, %108 : vector<8x8xf32>
    %110 = vector.broadcast %104 : f32 to vector<8x8xf32>
    %111 = arith.mulf %110, %109 : vector<8x8xf32>
    %112 = arith.addf %101, %111 : vector<8x8xf32>
    %113 = vector.extract_strided_slice %5 {offsets = [0, 8], sizes = [8, 1], strides = [1, 1]} : vector<8x15xf32> to vector<8x1xf32>
    %114 = vector.extract_strided_slice %10 {offsets = [8, 0], sizes = [1, 8], strides = [1, 1]} : vector<15x8xf32> to vector<1x8xf32>
    %c1_37 = arith.constant 1 : index
    %c3_38 = arith.constant 3 : index
    %115 = memref.load %arg7[%c1_37, %c3_38] : memref<3x5xf32, #tpu.memory_space<smem>>
    %116 = vector.broadcast %114 : vector<1x8xf32> to vector<8x8xf32>
    %117 = vector.broadcast %113 : vector<8x1xf32> to vector<8x8xf32>
    %118 = arith.subf %116, %117 : vector<8x8xf32>
    %cst_39 = arith.constant 0.000000e+00 : f32
    %119 = vector.broadcast %cst_39 : f32 to vector<8x8xf32>
    %120 = arith.maximumf %118, %119 : vector<8x8xf32>
    %121 = vector.broadcast %115 : f32 to vector<8x8xf32>
    %122 = arith.mulf %121, %120 : vector<8x8xf32>
    %123 = arith.addf %112, %122 : vector<8x8xf32>
    %124 = vector.extract_strided_slice %5 {offsets = [0, 9], sizes = [8, 1], strides = [1, 1]} : vector<8x15xf32> to vector<8x1xf32>
    %125 = vector.extract_strided_slice %10 {offsets = [9, 0], sizes = [1, 8], strides = [1, 1]} : vector<15x8xf32> to vector<1x8xf32>
    %c1_40 = arith.constant 1 : index
    %c4_41 = arith.constant 4 : index
    %126 = memref.load %arg7[%c1_40, %c4_41] : memref<3x5xf32, #tpu.memory_space<smem>>
    %127 = vector.broadcast %125 : vector<1x8xf32> to vector<8x8xf32>
    %128 = vector.broadcast %124 : vector<8x1xf32> to vector<8x8xf32>
    %129 = arith.subf %127, %128 : vector<8x8xf32>
    %cst_42 = arith.constant 0.000000e+00 : f32
    %130 = vector.broadcast %cst_42 : f32 to vector<8x8xf32>
    %131 = arith.maximumf %129, %130 : vector<8x8xf32>
    %132 = vector.broadcast %126 : f32 to vector<8x8xf32>
    %133 = arith.mulf %132, %131 : vector<8x8xf32>
    %134 = arith.addf %123, %133 : vector<8x8xf32>
    %cst_43 = arith.constant dense<0xFF800000> : vector<8xf32>
    %135 = vector.multi_reduction <maximumf>, %134, %cst_43 [1] : vector<8x8xf32> to vector<8xf32>
    %136 = vector.shape_cast %135 : vector<8xf32> to vector<8x1xf32>
    %137 = vector.broadcast %136 : vector<8x1xf32> to vector<8x8xf32>
    %138 = arith.subf %134, %137 : vector<8x8xf32>
    %139 = math.exp %138 : vector<8x8xf32>
    %cst_44 = arith.constant dense<0.000000e+00> : vector<8xf32>
    %140 = vector.multi_reduction <add>, %139, %cst_44 [1] : vector<8x8xf32> to vector<8xf32>
    %141 = vector.shape_cast %140 : vector<8xf32> to vector<8x1xf32>
    %142 = tpu.reciprocal %141 {approx = true} : vector<8x1xf32> -> vector<8x1xf32>
    %143 = vector.broadcast %142 : vector<8x1xf32> to vector<8x8xf32>
    %144 = arith.mulf %139, %143 : vector<8x8xf32>
    %145 = arith.addf %78, %144 : vector<8x8xf32>
    %cst_45 = arith.constant 0.000000e+00 : f32
    %146 = vector.broadcast %cst_45 : f32 to vector<8x8xf32>
    %147 = vector.extract_strided_slice %5 {offsets = [0, 10], sizes = [8, 1], strides = [1, 1]} : vector<8x15xf32> to vector<8x1xf32>
    %148 = vector.extract_strided_slice %10 {offsets = [10, 0], sizes = [1, 8], strides = [1, 1]} : vector<15x8xf32> to vector<1x8xf32>
    %c2_46 = arith.constant 2 : index
    %c0_47 = arith.constant 0 : index
    %149 = memref.load %arg7[%c2_46, %c0_47] : memref<3x5xf32, #tpu.memory_space<smem>>
    %150 = vector.broadcast %148 : vector<1x8xf32> to vector<8x8xf32>
    %151 = vector.broadcast %147 : vector<8x1xf32> to vector<8x8xf32>
    %152 = arith.subf %150, %151 : vector<8x8xf32>
    %cst_48 = arith.constant 0.000000e+00 : f32
    %153 = vector.broadcast %cst_48 : f32 to vector<8x8xf32>
    %154 = arith.maximumf %152, %153 : vector<8x8xf32>
    %155 = vector.broadcast %149 : f32 to vector<8x8xf32>
    %156 = arith.mulf %155, %154 : vector<8x8xf32>
    %157 = arith.addf %146, %156 : vector<8x8xf32>
    %158 = vector.extract_strided_slice %5 {offsets = [0, 11], sizes = [8, 1], strides = [1, 1]} : vector<8x15xf32> to vector<8x1xf32>
    %159 = vector.extract_strided_slice %10 {offsets = [11, 0], sizes = [1, 8], strides = [1, 1]} : vector<15x8xf32> to vector<1x8xf32>
    %c2_49 = arith.constant 2 : index
    %c1_50 = arith.constant 1 : index
    %160 = memref.load %arg7[%c2_49, %c1_50] : memref<3x5xf32, #tpu.memory_space<smem>>
    %161 = vector.broadcast %159 : vector<1x8xf32> to vector<8x8xf32>
    %162 = vector.broadcast %158 : vector<8x1xf32> to vector<8x8xf32>
    %163 = arith.subf %161, %162 : vector<8x8xf32>
    %cst_51 = arith.constant 0.000000e+00 : f32
    %164 = vector.broadcast %cst_51 : f32 to vector<8x8xf32>
    %165 = arith.maximumf %163, %164 : vector<8x8xf32>
    %166 = vector.broadcast %160 : f32 to vector<8x8xf32>
    %167 = arith.mulf %166, %165 : vector<8x8xf32>
    %168 = arith.addf %157, %167 : vector<8x8xf32>
    %169 = vector.extract_strided_slice %5 {offsets = [0, 12], sizes = [8, 1], strides = [1, 1]} : vector<8x15xf32> to vector<8x1xf32>
    %170 = vector.extract_strided_slice %10 {offsets = [12, 0], sizes = [1, 8], strides = [1, 1]} : vector<15x8xf32> to vector<1x8xf32>
    %c2_52 = arith.constant 2 : index
    %c2_53 = arith.constant 2 : index
    %171 = memref.load %arg7[%c2_52, %c2_53] : memref<3x5xf32, #tpu.memory_space<smem>>
    %172 = vector.broadcast %170 : vector<1x8xf32> to vector<8x8xf32>
    %173 = vector.broadcast %169 : vector<8x1xf32> to vector<8x8xf32>
    %174 = arith.subf %172, %173 : vector<8x8xf32>
    %cst_54 = arith.constant 0.000000e+00 : f32
    %175 = vector.broadcast %cst_54 : f32 to vector<8x8xf32>
    %176 = arith.maximumf %174, %175 : vector<8x8xf32>
    %177 = vector.broadcast %171 : f32 to vector<8x8xf32>
    %178 = arith.mulf %177, %176 : vector<8x8xf32>
    %179 = arith.addf %168, %178 : vector<8x8xf32>
    %180 = vector.extract_strided_slice %5 {offsets = [0, 13], sizes = [8, 1], strides = [1, 1]} : vector<8x15xf32> to vector<8x1xf32>
    %181 = vector.extract_strided_slice %10 {offsets = [13, 0], sizes = [1, 8], strides = [1, 1]} : vector<15x8xf32> to vector<1x8xf32>
    %c2_55 = arith.constant 2 : index
    %c3_56 = arith.constant 3 : index
    %182 = memref.load %arg7[%c2_55, %c3_56] : memref<3x5xf32, #tpu.memory_space<smem>>
    %183 = vector.broadcast %181 : vector<1x8xf32> to vector<8x8xf32>
    %184 = vector.broadcast %180 : vector<8x1xf32> to vector<8x8xf32>
    %185 = arith.subf %183, %184 : vector<8x8xf32>
    %cst_57 = arith.constant 0.000000e+00 : f32
    %186 = vector.broadcast %cst_57 : f32 to vector<8x8xf32>
    %187 = arith.maximumf %185, %186 : vector<8x8xf32>
    %188 = vector.broadcast %182 : f32 to vector<8x8xf32>
    %189 = arith.mulf %188, %187 : vector<8x8xf32>
    %190 = arith.addf %179, %189 : vector<8x8xf32>
    %191 = vector.extract_strided_slice %5 {offsets = [0, 14], sizes = [8, 1], strides = [1, 1]} : vector<8x15xf32> to vector<8x1xf32>
    %192 = vector.extract_strided_slice %10 {offsets = [14, 0], sizes = [1, 8], strides = [1, 1]} : vector<15x8xf32> to vector<1x8xf32>
    %c2_58 = arith.constant 2 : index
    %c4_59 = arith.constant 4 : index
    %193 = memref.load %arg7[%c2_58, %c4_59] : memref<3x5xf32, #tpu.memory_space<smem>>
    %194 = vector.broadcast %192 : vector<1x8xf32> to vector<8x8xf32>
    %195 = vector.broadcast %191 : vector<8x1xf32> to vector<8x8xf32>
    %196 = arith.subf %194, %195 : vector<8x8xf32>
    %cst_60 = arith.constant 0.000000e+00 : f32
    %197 = vector.broadcast %cst_60 : f32 to vector<8x8xf32>
    %198 = arith.maximumf %196, %197 : vector<8x8xf32>
    %199 = vector.broadcast %193 : f32 to vector<8x8xf32>
    %200 = arith.mulf %199, %198 : vector<8x8xf32>
    %201 = arith.addf %190, %200 : vector<8x8xf32>
    %cst_61 = arith.constant dense<0xFF800000> : vector<8xf32>
    %202 = vector.multi_reduction <maximumf>, %201, %cst_61 [1] : vector<8x8xf32> to vector<8xf32>
    %203 = vector.shape_cast %202 : vector<8xf32> to vector<8x1xf32>
    %204 = vector.broadcast %203 : vector<8x1xf32> to vector<8x8xf32>
    %205 = arith.subf %201, %204 : vector<8x8xf32>
    %206 = math.exp %205 : vector<8x8xf32>
    %cst_62 = arith.constant dense<0.000000e+00> : vector<8xf32>
    %207 = vector.multi_reduction <add>, %206, %cst_62 [1] : vector<8x8xf32> to vector<8xf32>
    %208 = vector.shape_cast %207 : vector<8xf32> to vector<8x1xf32>
    %209 = tpu.reciprocal %208 {approx = true} : vector<8x1xf32> -> vector<8x1xf32>
    %210 = vector.broadcast %209 : vector<8x1xf32> to vector<8x8xf32>
    %211 = arith.mulf %206, %210 : vector<8x8xf32>
    %212 = arith.addf %145, %211 : vector<8x8xf32>
    %cst_63 = arith.constant dense<0.000000e+00> : vector<8xf32>
    %213 = vector.multi_reduction <add>, %212, %cst_63 [0] : vector<8x8xf32> to vector<8xf32>
    %214 = vector.shape_cast %213 : vector<8xf32> to vector<1x8xf32>
    %cst_64 = arith.constant 3.000000e+00 : f32
    %215 = vector.broadcast %cst_64 : f32 to vector<1x8xf32>
    %216 = arith.addf %214, %215 : vector<1x8xf32>
    %217 = tpu.reciprocal %216 {approx = true} : vector<1x8xf32> -> vector<1x8xf32>
    %218 = tpu.iota {dimensions = array<i32: 0>} : vector<8x1xi32>
    %219 = tpu.iota {dimensions = array<i32: 1>} : vector<1x8xi32>
    %220 = vector.broadcast %218 : vector<8x1xi32> to vector<8x8xi32>
    %221 = vector.broadcast %219 : vector<1x8xi32> to vector<8x8xi32>
    %222 = arith.cmpi eq, %220, %221 : vector<8x8xi32>
    %cst_65 = arith.constant 3.000000e+00 : f32
    %223 = vector.broadcast %cst_65 : f32 to vector<8x8xf32>
    %224 = arith.addf %212, %223 : vector<8x8xf32>
    %225 = arith.select %222, %224, %212 : vector<8x8xi1>, vector<8x8xf32>
    %226 = vector.broadcast %217 : vector<1x8xf32> to vector<8x8xf32>
    %227 = arith.mulf %225, %226 : vector<8x8xf32>
    %228 = arith.truncf %227 : vector<8x8xf32> to vector<8x8xbf16>
    %c0_66 = arith.constant 0 : index
    %c0_67 = arith.constant 0 : index
    %c0_68 = arith.constant 0 : index
    %229 = vector.load %arg3[%c0_66, %c0_67, %c0_68] : memref<1x8x32xbf16, #tpu.memory_space<vmem>>, vector<1x8x32xbf16>
    %230 = vector.shape_cast %229 : vector<1x8x32xbf16> to vector<8x32xbf16>
    %cst_69 = arith.constant dense<0.000000e+00> : vector<8x32xf32>
    %231 = tpu.matmul %228, %230, %cst_69 {dimension_numbers = #tpu.dot_dimension_numbers<[1], [0], [0], [1], [0, 0, 1, 1], [], []>} : vector<8x8xbf16>, vector<8x32xbf16>, vector<8x32xf32> -> vector<8x32xf32>
    %232 = arith.truncf %231 : vector<8x32xf32> to vector<8x32xbf16>
    %c0_70 = arith.constant 0 : index
    %c0_71 = arith.constant 0 : index
    %233 = vector.load %arg8[%c0_70, %c0_71] : memref<32x128xbf16, #tpu.memory_space<vmem>>, vector<32x128xbf16>
    %cst_72 = arith.constant dense<0.000000e+00> : vector<8x128xf32>
    %234 = tpu.matmul %232, %233, %cst_72 {dimension_numbers = #tpu.dot_dimension_numbers<[1], [0], [0], [1], [0, 0, 1, 1], [], []>} : vector<8x32xbf16>, vector<32x128xbf16>, vector<8x128xf32> -> vector<8x128xf32>
    %c0_73 = arith.constant 0 : index
    %c0_74 = arith.constant 0 : index
    %235 = vector.load %arg9[%c0_73, %c0_74] : memref<1x128xf32, #tpu.memory_space<vmem>>, vector<1x128xf32>
    %236 = vector.broadcast %235 : vector<1x128xf32> to vector<8x128xf32>
    %237 = arith.addf %234, %236 : vector<8x128xf32>
    %c0_75 = arith.constant 0 : index
    %c0_76 = arith.constant 0 : index
    %c0_77 = arith.constant 0 : index
    %238 = vector.load %arg10[%c0_75, %c0_76, %c0_77] : memref<1x8x128xf32, #tpu.memory_space<vmem>>, vector<1x8x128xf32>
    %239 = vector.shape_cast %238 : vector<1x8x128xf32> to vector<8x128xf32>
    %240 = vector.shape_cast %237 : vector<8x128xf32> to vector<1x8x128xf32>
    tpu.vector_store %arg10[%c0_75, %c0_76, %c0_77], %240 {strides = array<i32>} : memref<1x8x128xf32, #tpu.memory_space<vmem>>, vector<1x8x128xf32>,
    return
  }
  func.func @transform_0(%arg0: i32) -> (i32, i32, i32) {
    %c0_i32 = arith.constant 0 : i32
    %c0_i32_0 = arith.constant 0 : i32
    %c0_i32_1 = arith.constant 0 : i32
    return %arg0, %c0_i32, %c0_i32_0 : i32, i32, i32
  }
  func.func @transform_1(%arg0: i32) -> (i32, i32, i32) {
    %c0_i32 = arith.constant 0 : i32
    %c0_i32_0 = arith.constant 0 : i32
    %c0_i32_1 = arith.constant 0 : i32
    return %arg0, %c0_i32, %c0_i32_0 : i32, i32, i32
  }
  func.func @transform_2(%arg0: i32) -> (i32, i32, i32) {
    %c0_i32 = arith.constant 0 : i32
    %c0_i32_0 = arith.constant 0 : i32
    %c0_i32_1 = arith.constant 0 : i32
    return %arg0, %c0_i32, %c0_i32_0 : i32, i32, i32
  }
  func.func @transform_3(%arg0: i32) -> (i32, i32) {
    %c0_i32 = arith.constant 0 : i32
    %c0_i32_0 = arith.constant 0 : i32
    %c0_i32_1 = arith.constant 0 : i32
    return %c0_i32, %c0_i32_0 : i32, i32
  }
  func.func @transform_4(%arg0: i32) -> (i32, i32) {
    %c0_i32 = arith.constant 0 : i32
    %c0_i32_0 = arith.constant 0 : i32
    %c0_i32_1 = arith.constant 0 : i32
    return %c0_i32, %c0_i32_0 : i32, i32
  }
  func.func @transform_5(%arg0: i32) -> (i32, i32) {
    %c0_i32 = arith.constant 0 : i32
    %c0_i32_0 = arith.constant 0 : i32
    %c0_i32_1 = arith.constant 0 : i32
    return %c0_i32, %c0_i32_0 : i32, i32
  }
  func.func @transform_6(%arg0: i32) -> (i32, i32) {
    %c0_i32 = arith.constant 0 : i32
    %c0_i32_0 = arith.constant 0 : i32
    %c0_i32_1 = arith.constant 0 : i32
    return %c0_i32, %c0_i32_0 : i32, i32
  }
  func.func @transform_7(%arg0: i32) -> (i32, i32) {
    %c0_i32 = arith.constant 0 : i32
    %c0_i32_0 = arith.constant 0 : i32
    %c0_i32_1 = arith.constant 0 : i32
    return %c0_i32, %c0_i32_0 : i32, i32
  }
  func.func @transform_8(%arg0: i32) -> (i32, i32) {
    %c0_i32 = arith.constant 0 : i32
    %c0_i32_0 = arith.constant 0 : i32
    %c0_i32_1 = arith.constant 0 : i32
    return %c0_i32, %c0_i32_0 : i32, i32
  }
  func.func @transform_9(%arg0: i32) -> (i32, i32, i32) {
    %c0_i32 = arith.constant 0 : i32
    %c0_i32_0 = arith.constant 0 : i32
    %c0_i32_1 = arith.constant 0 : i32
    return %arg0, %c0_i32, %c0_i32_0 : i32, i32, i32
  }
}

</mosaic_0001>

<bundles_post_ra>
// kernel: tpu_custom_call.1
= control target key start
LH: loop header
LB: loop body
LE: loop exit
PB: predicated region body
PF: predicated region fallthrough
CT: control target
= control target key end

     0   :  { %14 = vsyncpa [#allocation4], 0  ;;  %s1617_s0 = inlined_call_operand.vmem [shape: f32[2,8,5], index: 0, kind: input, shape index: {}]   ;;  %s1618_s1 = inlined_call_operand.vmem [shape: f32[2,5,8], index: 1, kind: input, shape index: {}]   ;;  %s1619_s2 = inlined_call_operand.vmem [shape: bf16[2,8,32], index: 2, kind: input, shape index: {}]   ;;  %s1620_s3 = inlined_call_operand.vmem [shape: f32[5,15], index: 3, kind: input, shape index: {}]   ;;  %s1621_s4 = inlined_call_operand.vmem [shape: f32[15,5], index: 4, kind: input, shape index: {}]   ;;  %s1622_s5 = inlined_call_operand.vmem [shape: f32[15,1], index: 5, kind: input, shape index: {}]   ;;  %s1623_s6 = inlined_call_operand.vmem [shape: f32[3,5], index: 6, kind: input, shape index: {}]   ;;  %s1624_s7 = inlined_call_operand.vmem [shape: bf16[32,128], index: 7, kind: input, shape index: {}]   ;;  %s1625_s8 = inlined_call_operand.vmem [shape: f32[1,128], index: 8, kind: input, shape index: {}]   ;;  %s1626_s9 = inlined_call_operand.hbm [shape: f32[2,8,128], index: 9, kind: output, shape index: {}]  }
   0x1   :  { %15 = vsyncpa [#allocation3], 0 }
   0x2   :  { %17 = vsyncpa [#allocation3 + $0x1], 0  ;;  %s1369_s30 = smov 0   ;;  %s1371_s10 = smov 0  }
   0x3   :  { %s1373_s11 = smov 0   ;;  %s1375_s12 = smov 0  }
   0x4 LB: > { %s1390_s13 = sadd.s32 4294967295, %s1298_s12   ;;  %s1048_s14 = sadd.s32 4294967294, %s1298_s12   ;;  %s1298_s12 = sphi %s1375_s12, %s1633_s12   ;;  %s1294_s11 = sphi %s1373_s11, %s1632_s11   ;;  %s1290_s10 = sphi %s1371_s10, %s1631_s10   ;;  %s1286_s30 = sphi %s1369_s30, %s1630_s30  }
   0x5   : > { %s1394_s15 = sadd.s32 1, %s1298_s12   ;;  %s234_s16 = sadd.s32 1, %s1294_s11 }
   0x6   : > { %s231_s17 = ssub.s32 %s1298_s12, %s1394_s15  ;;  %p244_p0 = scmp.ne.s32.totalorder %s1294_s11, %s1290_s10 }
   0x7   : > { %p232_p1 = scmp.eq.s32.totalorder %s231_s17, 0  ;;  %p245_p2 = scmp.eq.s32.totalorder %s1390_s13, 1 }
   0x8   : > { %p250_p3 = scmp.ne.s32.totalorder %s1290_s10, %s1286_s30  ;;  %p251_p4 = scmp.eq.s32.totalorder %s1048_s14, 1 }
   0x9   : > { %s1405_s18 = scalar_select %p232_p1, %s1294_s11, %s234_s16  }
   0xa   : > { %p1407_p5 = por %p245_p2, %p244_p0  ;;  %p1411_p6 = por %p251_p4, %p250_p3 }
   0xb   : > { %p1049_p7 = scmp.ge.s32.totalorder %s1298_s12, 1  ;;  %p258_p8 = scmp.lt.s32.totalorder %s1298_s12, 3 }
   0xc   : > { %p1134_p9 = scmp.eq.s32.totalorder %s1390_s13, 0  ;;  %s280_s24 = sshll.u32 %s1623_s6, 4  ;;  %s281_s24 = int_to_ptr.vmem [resolvable:$true] %s280_s24 }
   0xd   : > { %p1418_p10 = pnand %p1049_p7, %p258_p8  ;;  %s1219_s25 = scalar_lea.vmem %s281_s24, 64 }
   0xe   : > { %p1220_p13 = scmp.ne.s32.totalorder %s281_s24, %s1219_s25  ;;  %p1227_p3 = scmp.lt.s32.totalorder %s281_s24, %s281_s24 }
   0xf   : > { %p1126_p11 = pneg %p1418_p10  ;;  %p1228_p4 = scmp.lt.s32.totalorder %s1219_s25, %s1219_s25 }
  0x11   : > { %p1127_p12 = pnand %p1134_p9, %p1126_p11  ;;  %p1229_p7 = por %p1228_p4, %p1227_p3 }
  0x13   : > { %p1221_p0 = pneg %p1127_p12 }
  0x15   : > { %p1222_p1 = pnand %p1221_p0, %p1220_p13 }
  0x17   : > { %p1223_p2 = pneg %p1222_p1 }
  0x19   : > { %p1230_p8 = pnand %p1229_p7, %p1223_p2 }
  0x1b   : > { %1233 = shalt.err (!%p1230_p8)
}
  0x1c   : > { %s1300_s26 = smov [#allocation2]   ;;  %320 = sbr.rel (%p1418_p10) target bundleno = 1166 (0x48e), region = 56 }
  0x1d   : > { %1129 = dma.vmem_to_smem (!%p1127_p12), %s281_s24, 64, %s1300_s26, [#allocation4]  }
  0x21   : > { %1277 = dma.done.wait (%p1134_p9), [#allocation4], 64  }
  0x22   : > { %1279 = vsyncadd (%p1134_p9), [#allocation4], 4294967232 }
  0x23   : > { %326 = sfence }
  0x24   : > { %v379_v0 = vld [vmem:[%s1620_s3] sm:$0x1f]  ;;  %vm384_vm0 = vcmask 1044480   ;;  %p364_p11 = scmp.lt.s32.totalorder %s1390_s13, 1  ;;  %v1301_v1 = vmov 0.0   ;;  %vm1302_vm1 = vmmov 0   ;;  %v557_v27 = vlaneseq }
  0x25   : > { %1096 = vmatprep.subr.mxu0 %v1301_v1  ;;  %1098 = vmatprep.mubr.msk.f32.mxu0 %vm1302_vm1, %v1301_v1  ;;  %vm380_vm2 = vcmask 39936   ;;  %v458_v2 = vld [vmem:[%s1621_s4] sm:$0xff]  ;;  %v1303_v4 = vmov 0   ;;  %v461_v5 = vld [vmem:[%s1622_s5 + $0x8] sm:$0x7f]  ;;  %v1304_v9 = vmov 5  }
  0x26   : > { %v460_v3 = vld [vmem:[%s1622_s5] sm:$0xff]  ;;  %1097 = vmatpush3.msk.msra.mxu0 %vm384_vm0, %v379_v0  ;;  %s1450_s21 = scalar_select %p364_p11, %s1390_s13, 1  ;;  %1103 = vmatprep.mubr.msk.f32.mxu1 %vm380_vm2, %v458_v2  ;;  %v459_v8 = vld [vmem:[%s1621_s4 + $0x8] sm:$0x7f]  ;;  %v1305_v12 = vmov 7   ;;  %v1306_v13 = vmov 1  }
  0x27   : > { %1187 = vset.pattern.permute.xlu0 %v1303_v4  ;;  %1188 = vset.pattern.permute.xlu1 %v1303_v4  ;;  %v1307_v14 = vmov 3   ;;  %v1308_v15 = vmov 6   ;;  %v1309_v16 = vmov 4   ;;  %v1310_v17 = vmov 2   ;;  %s556_s23 = sld [smem:[#allocation2]] }
  0x28   : > { %s1055_s22 = sshll.u32 %s1450_s21, 3  ;;  %464 = vperm.xlu0 %1187, %v460_v3   ;;  %1106 = vmatprep.subr.bf16.mxu0 %v1301_v1  ;;  %v1311_v18 = vmov 14   ;;  %v1312_v19 = vmov 10   ;;  %v1313_v20 = vmov 11   ;;  %v1314_v21 = vmov 8   ;;  %s1064_s24 = sld [smem:[#allocation2 + $0x2]] }
  0x29   : > { %s367_s25 = scalar_lea.vmem %s1617_s0, %s1055_s22  ;;  %s371_s28 = scalar_lea.vmem %s1618_s1, %s1055_s22  ;;  %v1315_v22 = vmov 12   ;;  %v1316_v23 = vmov 9   ;;  %v1317_v24 = vmov 13   ;;  %v1481_v29 = vshrl.u32 %v557_v27, 7 }
  0x2a   : > { %v377_v6 = vld [vmem:[%s367_s25] sm:$0xff]  ;;  %s1063_s22 = sld [smem:[#allocation2 + $0x1]]  ;;  %vm627_vm3 = vcmask 64512   ;;  %vm826_vm4 = vcmask 1043456   ;;  %vm894_vm6 = vcmask 261120  }
  0x2b   : > { %v378_v7 = vld [vmem:[%s371_s28] sm:$0x1f]  ;;  %1099 = vmatmul.mubr.msk.f32.vlgmr.msra.gmra.mxu0 %vm380_vm2, %v377_v6  ;;  %v574_v33 = vsub.s32 1, %v1481_v29  ;;  %v559_v35 = vsub.s32 0, %v1481_v29  ;;  %v602_v40 = vsub.s32 3, %v1481_v29  ;;  %v616_v42 = vsub.s32 4, %v1481_v29 }
  0x2c   : > { %1101 = vmatprep.subr.msk.mxu1 %vm384_vm0, %v378_v7  ;;  %469 = vperm.xlu0 %1187, %v461_v5   ;;  %v588_v43 = vsub.s32 2, %v1481_v29  ;;  %s1065_s25 = sld [smem:[#allocation2 + $0x3]]  ;;  %v657_v2 = vsub.s32 6, %v1481_v29 }
  0x2d   : > { %1102 = vmatpush3.msk.msra.mxu1 %vm384_vm0, %v378_v7  ;;  %1108 = vmatprep.mubr.msk.bf16.mxu0 %vm1302_vm1, %v1301_v1  ;;  %s1066_s26 = sld [smem:[#allocation2 + $0x4]]  ;;  %v568_v54 = vstv %s556_s23  ;;  %v643_v7 = vsub.s32 5, %v1481_v29 }
  0x2e   : > { %1104 = vmatmul.mubr.msk.f32.vlgmr.msra.gmra.mxu1 %vm380_vm2, %v459_v8  ;;  %1112 = vmatprep.subr.bf16.mxu1 %v1301_v1  ;;  %v596_v60 = vstv %s1064_s24  ;;  %s1068_s27 = sld [smem:[#allocation2 + $0x81]] }
  0x2f   : > { %1116 = vmatprep.mubr.msk.bf16.mxu1 %vm1302_vm1, %v1301_v1  ;;  %s1067_s28 = sld [smem:[#allocation2 + $0x80]] }
  0x30   : > { %1190 = vset.pattern.permute.xlu0 %v1304_v9  ;;  %v582_v51 = vstv %s1063_s22  ;;  %s1512_s29 = sld [smem:[#allocation2 + $0x82]] }
  0x31   : > { %s1514_s14 = sld [smem:[#allocation2 + $0x83]] }
  0x32   : > { %v610_v0 = vstv %s1065_s25  ;;  %s1518_s16 = sld [smem:[#allocation2 + $0x100]] }
  0x33   : > { %v624_v8 = vstv %s1066_s26  ;;  %s1521_s17 = sld [smem:[#allocation2 + $0x101]]  ;;  %s1057_s26 = sshll.u32 %s1450_s21, 2 }
  0x34   : > { %s1525_s22 = sld [smem:[#allocation2 + $0x84]] }
  0x35   : > { %s1527_s23 = sld [smem:[#allocation2 + $0x102]] }
  0x36   : > { %s1535_s24 = sld [smem:[#allocation2 + $0x103]] }
  0x37   : > { %s1537_s25 = sld [smem:[#allocation2 + $0x104]] }
  0xa3   : > { %v465_v25 = vpop.permute.xlu0 %464 }
  0xa7   : > { %v1476_v26 = vpop.permute.xlu0 %469 }
  0xeb   : > { %v454_v10 = vpop.f32.mrf.mxu0 }
  0xec   : > { %646 = vperm.xlu0 %1190, %v454_v10   ;;  %563 = vperm.xlu1 %1188, %v454_v10  }
  0xed   : > { %v1100_v11 = vpop.f32.mrf.mxu0 }
  0xee   : > { %v1478_v28 = vpop.f32.mrf.mxu1 }
  0xf0   : > { %1193 = vset.pattern.permute.xlu0 %v1305_v12  ;;  %1189 = vset.pattern.permute.xlu1 %v1306_v13  ;;  %v547_v30 = vpop.f32.mrf.mxu1 }
  0xf1   : > { %674 = vperm.xlu0 %1193, %v454_v10   ;;  %577 = vperm.xlu1 %1189, %v454_v10   ;;  %v548_v34 = vadd.f32 %v547_v30, %v465_v25  ;;  %v665_v30 = vstv %s1068_s27 }
  0xf3   : > { %v575_v36 = vrot.slane %v548_v34, %v574_v33  ;;  %v560_v39 = vrot.slane %v548_v34, %v559_v35  ;;  %v603_v45 = vrot.slane %v548_v34, %v602_v40  ;;  %v617_v49 = vrot.slane %v548_v34, %v616_v42 }
  0xf4   : > { %v589_v50 = vrot.slane %v548_v34, %v588_v43  ;;  %v658_v11 = vrot.slane %v548_v34, %v657_v2 }
  0xf5   : > { %1196 = vset.pattern.permute.xlu0 %v1307_v14  ;;  %1191 = vset.pattern.permute.xlu1 %v1308_v15  ;;  %v644_v14 = vrot.slane %v548_v34, %v643_v7  ;;  %v671_v15 = vsub.s32 7, %v1481_v29 }
  0xf6   : > { %605 = vperm.xlu0 %1196, %v454_v10   ;;  %660 = vperm.xlu1 %1191, %v454_v10  }
  0xfa   : > { %1199 = vset.pattern.permute.xlu0 %v1309_v16  ;;  %1192 = vset.pattern.permute.xlu1 %v1310_v17 }
  0xfb   : > { %619 = vperm.xlu0 %1199, %v454_v10   ;;  %591 = vperm.xlu1 %1192, %v454_v10  }
  0xff   : > { %1202 = vset.pattern.permute.xlu0 %v1311_v18  ;;  %1194 = vset.pattern.permute.xlu1 %v1312_v19 }
 0x100   : > { %784 = vperm.xlu0 %1202, %v454_v10   ;;  %728 = vperm.xlu1 %1194, %v454_v10  }
 0x104   : > { %1195 = vset.pattern.permute.xlu1 %v1313_v20  ;;  %v553_v20 = vadd.f32 %v1478_v28, %v1476_v26 }
 0x105   : > { %742 = vperm.xlu1 %1195, %v454_v10  }
 0x106   : > { %v686_v25 = vrot.slane %v553_v20, %v559_v35 }
 0x109   : > { %1197 = vset.pattern.permute.xlu1 %v1314_v21 }
 0x10a   : > { %688 = vperm.xlu1 %1197, %v454_v10  }
 0x10e   : > { %1198 = vset.pattern.permute.xlu1 %v1315_v22  ;;  %v672_v22 = vrot.slane %v548_v34, %v671_v15  ;;  %v726_v34 = vrot.slane %v553_v20, %v588_v43  ;;  %v693_v43 = vstv %s1514_s14  ;;  %v789_v15 = vstv %s1537_s25 }
 0x10f   : > { %756 = vperm.xlu1 %1198, %v454_v10  }
 0x113   : > { %1200 = vset.pattern.permute.xlu1 %v1316_v23 }
 0x114   : > { %702 = vperm.xlu1 %1200, %v454_v10  }
 0x118   : > { %1201 = vset.pattern.permute.xlu1 %v1317_v24 }
 0x119   : > { %770 = vperm.xlu1 %1201, %v454_v10  }
 0x167   : > { %v1483_v31 = vpop.permute.xlu0 %646  ;;  %v564_v32 = vpop.permute.xlu1 %563 }
 0x168   : > { %v566_v44 = vsub.f32 %v560_v39, %v564_v32  ;;  %v649_v21 = vsub.f32 %v644_v14, %v1483_v31  ;;  %v651_v31 = vstv %s1067_s28 }
 0x16a   : > { %v567_v52 = vmax.f32 %v566_v44, 0.0  ;;  %v650_v32 = vmax.f32 %v649_v21, 0.0 }
 0x16c   : > { %v1489_v37 = vpop.permute.xlu0 %674  ;;  %v578_v38 = vpop.permute.xlu1 %577  ;;  %v569_v61 = vmul.f32 %v568_v54, %v567_v52  ;;  %v747_v54 = vstv %s1521_s17 }
 0x16d   : > { %v580_v41 = vsub.f32 %v575_v36, %v578_v38  ;;  %v677_v26 = vsub.f32 %v672_v22, %v1489_v37  ;;  %v740_v36 = vrot.slane %v553_v20, %v602_v40  ;;  %v652_v37 = vmul.f32 %v651_v31, %v650_v32 }
 0x16f   : > { %v581_v48 = vmax.f32 %v580_v41, 0.0  ;;  %v754_v41 = vrot.slane %v553_v20, %v616_v42  ;;  %v678_v44 = vmax.f32 %v677_v26, 0.0 }
 0x171   : > { %v606_v46 = vpop.permute.xlu0 %605  ;;  %v661_v47 = vpop.permute.xlu1 %660  ;;  %v583_v57 = vmul.f32 %v582_v51, %v581_v48 }
 0x172   : > { %v608_v53 = vsub.f32 %v603_v45, %v606_v46  ;;  %v663_v18 = vsub.f32 %v658_v11, %v661_v47  ;;  %v679_v46 = vstv %s1512_s29  ;;  %s375_s29 = scalar_lea.vmem %s1619_s2, %s1057_s26  ;;  %s1083_s26 = sshll.u32 %s1390_s13, 7 }
 0x173   : > { %v584_v3 = vadd.f32 %v583_v57, %v569_v61  ;;  %v680_v52 = vmul.f32 %v679_v46, %v678_v44  ;;  %v761_v61 = vstv %s1527_s23  ;;  %s1318_s13 = smov [#allocation5]  }
 0x174   : > { %v609_v62 = vmax.f32 %v608_v53, 0.0  ;;  %v664_v24 = vmax.f32 %v663_v18, 0.0 }
 0x176   : > { %v620_v55 = vpop.permute.xlu0 %619  ;;  %v592_v56 = vpop.permute.xlu1 %591  ;;  %v611_v9 = vmul.f32 %v610_v0, %v609_v62  ;;  %v666_v38 = vmul.f32 %v665_v30, %v664_v24 }
 0x177   : > { %v622_v58 = vsub.f32 %v617_v49, %v620_v55  ;;  %v594_v59 = vsub.f32 %v589_v50, %v592_v56  ;;  %v700_v49 = vrot.slane %v553_v20, %v574_v33  ;;  %v782_v50 = vrot.slane %v553_v20, %v657_v2 }
 0x178   : > { %v667_v40 = vadd.f32 %v666_v38, %v652_v37  ;;  %v768_v2 = vrot.slane %v553_v20, %v643_v7  ;;  %v822_v37 = vld [vmem:[%s375_s29] sm:$0xf] }
 0x179   : > { %v595_v63 = vmax.f32 %v594_v59, 0.0  ;;  %v623_v4 = vmax.f32 %v622_v58, 0.0  ;;  %v707_v59 = vstv %s1525_s22  ;;  %v828_v44 = vsel %vm826_vm4, %v822_v37, 0  ;;  %s361_s22 = sand.u32 1, %s1290_s10  }
 0x17a   : > { %v681_v33 = vadd.f32 %v680_v52, %v667_v40  ;;  %1107 = vmatpush3.bf16.msra.mxu0 %v828_v44  ;;  %s1054_s23 = sshll.u32 %s361_s22, 3  ;;  %s940_s21 = scalar_lea.sflag [#allocation3], %s361_s22 }
 0x17b   : > { %v597_v5 = vmul.f32 %v596_v60, %v595_v63  ;;  %v729_v6 = vpop.permute.xlu1 %728  ;;  %v625_v12 = vmul.f32 %v624_v8, %v623_v4  ;;  %v785_v53 = vpop.permute.xlu0 %784  ;;  %v733_v60 = vstv %s1518_s16  ;;  %s363_s27 = scalar_lea.vmem [#allocation5], %s1054_s23  ;;  %s1576_s16 = scalar_lea.hbm %s1626_s9, %s1083_s26 }
 0x17c   : > { %v731_v47 = vsub.f32 %v726_v34, %v729_v6  ;;  %v787_v63 = vsub.f32 %v782_v50, %v785_v53  ;;  %s953_s28 = sshll.u32 %s363_s27, 4  ;;  %s1238_s23 = sshll.u32 %s1318_s13, 4  ;;  %s1578_s28 = int_to_ptr.vmem [resolvable:$true] %s953_s28  ;;  %s1239_s23 = int_to_ptr.vmem [resolvable:$false] %s1238_s23 }
 0x17d   : > { %v598_v10 = vadd.f32 %v597_v5, %v584_v3  ;;  %s1234_s17 = scalar_lea.vmem %s1578_s28, 128  ;;  %p1241_p13 = scmp.lt.s32.totalorder %s1578_s28, %s1239_s23 }
 0x17e   : > { %v732_v57 = vmax.f32 %v731_v47, 0.0  ;;  %p1235_p9 = scmp.ne.s32.totalorder %s1578_s28, %s1234_s17 }
 0x17f   : > { %v612_v13 = vadd.f32 %v611_v9, %v598_v10  ;;  %v775_v10 = vstv %s1535_s24  ;;  %s1240_s24 = scalar_lea.vmem %s1239_s23, 256 }
 0x180   : > { %v743_v16 = vpop.permute.xlu1 %742  ;;  %v734_v6 = vmul.f32 %v733_v60, %v732_v57  ;;  %p1236_p10 = pnand %p1235_p9, %p1407_p5  ;;  %p1242_p0 = scmp.lt.s32.totalorder %s1240_s24, %s1234_s17 }
 0x181   : > { %v1505_v17 = vadd.f32 %v625_v12, %v612_v13  ;;  %v745_v39 = vsub.f32 %v740_v36, %v743_v16  ;;  %v788_v12 = vmax.f32 %v787_v63, 0.0 }
 0x182   : > { %p1237_p12 = pneg %p1236_p10  ;;  %p1243_p1 = por %p1242_p0, %p1241_p13 }
 0x183   : > { %v628_v19 = vsel %vm627_vm3, %v1505_v17, -inf  ;;  %v746_v51 = vmax.f32 %v745_v39, 0.0  ;;  %v790_v21 = vmul.f32 %v789_v15, %v788_v12 }
 0x184   : > { %629 = vmax.xlane.f32.xlu1 %v628_v19  ;;  %p1244_p2 = pnand %p1243_p1, %p1237_p12 }
 0x185   : > { %v689_v23 = vpop.permute.xlu1 %688  ;;  %v748_v0 = vmul.f32 %v747_v54, %v746_v51 }
 0x186   : > { %v691_v28 = vsub.f32 %v686_v25, %v689_v23 }
 0x187   : > { %v749_v13 = vadd.f32 %v748_v0, %v734_v6 }
 0x188   : > { %v692_v45 = vmax.f32 %v691_v28, 0.0 }
 0x18a   : > { %v757_v35 = vpop.permute.xlu1 %756  ;;  %v694_v55 = vmul.f32 %v693_v43, %v692_v45  ;;  %v1203_v45 = vld [vmem:[%s1624_s7 + $0x8] sm:$0xff]  }
 0x18b   : > { %v759_v48 = vsub.f32 %v754_v41, %v757_v35  ;;  %1113 = vmatpush3.bf16.msra.mxu1 %v1203_v45 }
 0x18c   : > { %v695_v5 = vadd.f32 %v694_v55, %v681_v33  ;;  %1114 = vmatprep.subr.bf16.mxu1 %v1301_v1 }
 0x18d   : > { %v760_v58 = vmax.f32 %v759_v48, 0.0 }
 0x18f   : > { %v703_v42 = vpop.permute.xlu1 %702  ;;  %v762_v8 = vmul.f32 %v761_v61, %v760_v58  ;;  %v816_v61 = vand.u32 127, %v557_v27 }
 0x190   : > { %v705_v56 = vsub.f32 %v700_v49, %v703_v42 }
 0x191   : > { %v763_v18 = vadd.f32 %v762_v8, %v749_v13  ;;  %vm817_vm5 = vcmp.eq.s32.totalorder %v1481_v29, %v816_v61  ;;  %v1078_v29 = vld [vmem:[%s1625_s8] ss:$0 sm:$0xff] }
 0x192   : > { %v706_v62 = vmax.f32 %v705_v56, 0.0 }
 0x194   : > { %v708_v3 = vmul.f32 %v707_v59, %v706_v62  ;;  %v771_v4 = vpop.permute.xlu1 %770 }
 0x195   : > { %v773_v9 = vsub.f32 %v768_v2, %v771_v4 }
 0x196   : > { %v709_v11 = vadd.f32 %v708_v3, %v695_v5  ;;  %v1204_v3 = vld [vmem:[%s1624_s7] sm:$0xff]  }
 0x197   : > { %v774_v14 = vmax.f32 %v773_v9, 0.0  ;;  %1115 = vmatpush3.bf16.msra.mxu1 %v1204_v3 }
 0x198   : > { %v710_v16 = vsel %vm627_vm3, %v709_v11, -inf }
 0x199   : > { %v776_v19 = vmul.f32 %v775_v10, %v774_v14  ;;  %711 = vmax.xlane.f32.xlu0 %v710_v16 }
 0x19b   : > { %v777_v22 = vadd.f32 %v776_v19, %v763_v18 }
 0x19d   : > { %v791_v7 = vadd.f32 %v790_v21, %v777_v22 }
 0x19f   : > { %v792_v20 = vsel %vm627_vm3, %v791_v7, -inf }
 0x1a0   : > { %793 = vmax.xlane.f32.xlu1 %v792_v20 }
 0x20d   : > { %v630_v23 = vpop.xlane.xlu1 %629 }
 0x20e   : > { %v631_v24 = vsub.f32 %v1505_v17, %v630_v23 }
 0x210   : > { %v632_v25 = vmul.f32 1.442695, %v631_v24 }
 0x212   : > { %1205 = vpow2.f32 %v632_v25 }
 0x21f   : > { %v1206_v30 = vpop.eup %1205 }
 0x220   : > { %v634_v32 = vsel %vm627_vm3, %v1206_v30, 0.0 }
 0x221   : > { %635 = vadd.xlane.f32.xlu0 %v634_v32 }
 0x222   : > { %v712_v26 = vpop.xlane.xlu0 %711 }
 0x223   : > { %v713_v28 = vsub.f32 %v709_v11, %v712_v26 }
 0x225   : > { %v714_v31 = vmul.f32 1.442695, %v713_v28 }
 0x227   : > { %1207 = vpow2.f32 %v714_v31 }
 0x229   : > { %v794_v34 = vpop.xlane.xlu1 %793 }
 0x22a   : > { %v795_v36 = vsub.f32 %v791_v7, %v794_v34 }
 0x22c   : > { %v796_v38 = vmul.f32 1.442695, %v795_v36 }
 0x22e   : > { %1209 = vpow2.f32 %v796_v38 }
 0x234   : > { %v1208_v35 = vpop.eup %1207 }
 0x235   : > { %v716_v39 = vsel %vm627_vm3, %v1208_v35, 0.0 }
 0x236   : > { %717 = vadd.xlane.f32.xlu1 %v716_v39 }
 0x23b   : > { %v1210_v17 = vpop.eup %1209 }
 0x23c   : > { %v798_v41 = vsel %vm627_vm3, %v1210_v17, 0.0 }
 0x23d   : > { %799 = vadd.xlane.f32.xlu0 %v798_v41 }
 0x2aa   : > { %v636_v47 = vpop.xlane.xlu0 %635 }
 0x2bf   : > { %v718_v46 = vpop.xlane.xlu1 %717 }
 0x2c0   : > { %1211 = vrcp.f32 %v718_v46 }
 0x2c1   : > { %1213 = vrcp.f32 %v636_v47 }
 0x2c6   : > { %v800_v43 = vpop.xlane.xlu0 %799 }
 0x2c7   : > { %1215 = vrcp.f32 %v800_v43 }
 0x2cd   : > { %v1212_v48 = vpop.eup %1211 }
 0x2ce   : > { %v1214_v40 = vpop.eup %1213  ;;  %v720_v49 = vmul.f32 %v1212_v48, %v1208_v35 }
 0x2cf   : > { %v638_v50 = vmul.f32 %v1214_v40, %v1206_v30 }
 0x2d1   : > { %v721_v42 = vadd.f32 %v720_v49, %v638_v50 }
 0x2d4   : > { %v1216_v51 = vpop.eup %1215 }
 0x2d5   : > { %v802_v52 = vmul.f32 %v1216_v51, %v1210_v17 }
 0x2d7   : > { %v803_v53 = vadd.f32 %v802_v52, %v721_v42 }
 0x2d9   : > { %v804_v54 = vsel %vm627_vm3, %v803_v53, 0.0  ;;  %v818_v62 = vadd.f32 3.0, %v803_v53 }
 0x2da   : > { %v805_v55 = vrot.slane %v804_v54, 4 }
 0x2db   : > { %v819_v63 = vsel %vm817_vm5, %v818_v62, %v803_v53 }
 0x2dc   : > { %v806_v56 = vadd.f32 %v805_v55, %v804_v54 }
 0x2de   : > { %v807_v57 = vrot.slane %v806_v56, 2 }
 0x2e0   : > { %v808_v1 = vadd.f32 %v807_v57, %v806_v56 }
 0x2e2   : > { %v809_v58 = vrot.slane %v808_v1, 1 }
 0x2e4   : > { %v810_v59 = vadd.f32 %v809_v58, %v808_v1 }
 0x2e6   : > { %v811_v60 = vadd.f32 3.0, %v810_v59 }
 0x2e8   : > { %1217 = vrcp.f32 %v811_v60 }
 0x2f5   : > { %v1218_v33 = vpop.eup %1217 }
 0x2f6   : > { %v820_v0 = vmul.f32 %v1218_v33, %v819_v63 }
 0x2f8   : > { %v821_v2 = vpack.c.bf16 %v820_v0, %v820_v0 }
 0x2fa   : > { %1109 = vmatmul.mubr.msk.bf16.vlgmr.msra.gmra.mxu0 %vm627_vm3, %v821_v2 }
 0x3ba   : > { %v864_v4 = vpop.f32.mrf.mxu0 }
 0x3bb   : > { %v870_v5 = vpack.c.bf16 %v864_v4, %v864_v4 }
 0x3bc   : > { %v1110_v27 = vpop.f32.mrf.mxu0 }
 0x3bd   : > { %1117 = vmatmul.mubr.msk.bf16.vlgmr.msra.gmra.mxu1 %vm894_vm6, %v870_v5 }
 0x3be   : > { %v867_v6 = vpop.f32.mrf.mxu0 }
 0x3c0   : > { %v1111_v8 = vpop.f32.mrf.mxu0 }
 0x47d   : > { %v932_v9 = vpop.f32.mrf.mxu1 }
 0x47e   : > { %v933_v10 = vadd.f32 %v1078_v29, %v932_v9 }
 0x47f   : > { %v1118_v11 = vpop.f32.mrf.mxu1 }
 0x480   : > { %938 = vst [vmem:[%s363_s27] sm:$0xff] %v933_v10 }
 0x481   : > { %v935_v12 = vpop.f32.mrf.mxu1 }
 0x482   : > { %1247 = shalt.err (!%p1244_p2)
}
 0x483   : > { %s1248_s25 = scalar_lea.hbm %s1576_s16, 128  ;;  %s1252_s27 = scalar_lea.hbm %s1626_s9, 256 }
 0x484   : > { %p1249_p3 = scmp.ne.s32.totalorder %s1576_s16, %s1248_s25  ;;  %p1253_p8 = scmp.lt.s32.totalorder %s1576_s16, %s1626_s9 }
 0x485   : > { %p1254_p11 = scmp.lt.s32.totalorder %s1252_s27, %s1248_s25 }
 0x486   : > { %p1250_p4 = pnand %p1249_p3, %p1407_p5 }
 0x487   : > { %p1255_p9 = por %p1254_p11, %p1253_p8 }
 0x488   : > { %p1251_p7 = pneg %p1250_p4 }
 0x48a   : > { %p1256_p10 = pnand %p1255_p9, %p1251_p7 }
 0x48c   : > { %1259 = shalt.err (!%p1256_p10)
}
 0x48d   : > { %1124 = dma.vmem_to_hbm [thread:$0]  (%p1407_p5), %s1578_s28, 128, %s1576_s16, %s940_s21   ;;  %v1119_v13 = vpop.f32.mrf.mxu1 }
 0x48e PF: > { %p1136_p12 = scmp.ge.s32.totalorder %s1298_s12, 2  ;;  %s965_s17 = sand.u32 1, %s1286_s30  }
 0x48f   : > { %s966_s13 = scalar_lea.sflag [#allocation3], %s965_s17 }
 0x490   : > { %p1131_p13 = pnand %p1136_p12, %p1411_p6 }
 0x492   : > { %p1132_p0 = pneg %p1131_p13 }
 0x494   : > { %1281 = dma.done.wait (%p1132_p0), %s966_s13, 128  }
 0x495   : > { %1283 = vsyncadd (%p1132_p0), %s966_s13, 4294967168  ;;  %p20_p1 = scmp.ge.s32.totalorder %s1394_s15, 4   ;;  %s1630_s30 = smov %s1290_s10 }
 0x496   : > { %s1631_s10 = smov %s1294_s11  ;;  %s1632_s11 = smov %s1405_s18 }
 0x497   : > { %s1633_s12 = smov %s1394_s15  ;;  %22 = sbr.rel (!%p20_p1) target bundleno = 4 (0x4), region = 102 }
 0x49c   :  { %971 = vsyncpa [#allocation3], 1 }
 0x49d   :  { %973 = vsyncpa [#allocation3 + $0x1], 1 }
 0x49e   :  { %974 = vsyncpa [#allocation4], 1 }
 0x49f   :  { %976 = vsyncpa [#allocation4 + $0x1], 1 }

</bundles_post_ra>
